<compile_context>
chip_gen: v6e
topology: v6e:2x2x1
jax: 0.10.0
libtpu: 0.0.40
codegen_flags: <defaults>
</compile_context>

<pallas_src>
import functools

import jax
import jax.numpy as jnp
from jax import lax
from jax.experimental import pallas as pl
from jax.experimental.pallas import tpu as pltpu


def _smooth_ce_kernel(pred_ref, gt_ref, out_ref, *, label_smoothing):
    """Per-tile masked, label-smoothed NLL partial sums.

    pred_ref: (1, C, TL) native dtype  (classes on sublanes, tokens on lanes)
    gt_ref:   (1, 1, TL) int32, -1 marks ignored / padded tokens
    out_ref:  (1, 1, 8, 128) f32 partials: row 0 = loss sum, row 1 = valid count
    """
    logits = pred_ref[0].astype(jnp.float32)          # (C, TL)
    gt = gt_ref[0]                                    # (1, TL) int32
    c, tl = logits.shape

    # Numerically stable log-softmax pieces along the class (sublane) axis.
    m = jnp.max(logits, axis=0, keepdims=True)        # (1, TL)
    shifted = logits - m                              # (C, TL)
    sum_exp = jnp.sum(jnp.exp(shifted), axis=0, keepdims=True)
    lse = jnp.log(sum_exp)                            # (1, TL)

    # log_prob at the target class, without materializing a one-hot target tensor.
    class_ids = lax.broadcasted_iota(jnp.int32, (c, tl), 0)
    hit = class_ids == gt                             # (C, TL) bool (broadcast)
    shifted_gt = jnp.sum(jnp.where(hit, shifted, 0.0), axis=0, keepdims=True)
    lp_gt = shifted_gt - lse                          # (1, TL)

    eps = float(label_smoothing)
    if eps > 0.0:
        # Folded smoothed target:
        #   loss = -[(1-eps-eps/(C-1)) * lp_gt + (eps/(C-1)) * sum_c log_prob]
        sum_lp = jnp.sum(shifted, axis=0, keepdims=True) - c * lse
        coef_gt = 1.0 - eps - eps / (c - 1)
        coef_all = eps / (c - 1)
        per_tok = -(coef_gt * lp_gt + coef_all * sum_lp)   # (1, TL)
    else:
        per_tok = -lp_gt                                   # (1, TL)

    valid = gt >= 0                                        # (1, TL)
    loss_sum = jnp.sum(jnp.where(valid, per_tok, 0.0), keepdims=True)   # (1, 1)
    cnt = jnp.sum(valid.astype(jnp.float32), keepdims=True)             # (1, 1)

    # Lane-dense partial block: row 0 carries loss_sum, row 1 carries count.
    row_ids = lax.broadcasted_iota(jnp.int32, (8, 128), 0)
    partial = jnp.where(row_ids == 0, loss_sum,
                        jnp.where(row_ids == 1, cnt, 0.0))
    out_ref[0, 0] = partial


def smooth_cross_entropy(pred, gt, *, label_smoothing=0.0, ignore_index=255,
                         num_classes=13, weight=None, tile_l=8192):
    """Forward pass of pcr SmoothCrossEntropy (weight=None path)."""
    # TODO(synk): per-class `weight` rescaling not supported (module default is None).
    assert weight is None

    if pred.ndim == 2:
        # Row-matrix input (N, C): classes must go on sublanes -> one small transpose.
        pred3 = pred.T[None, ...]                     # (1, C, N)
        gt2 = gt.reshape(1, -1)
    else:
        b, c = pred.shape[0], pred.shape[1]
        pred3 = pred.reshape(b, c, -1)                # no-op copy-free for (B, C, L)
        gt2 = gt.reshape(b, -1)

    B, C, L = pred3.shape
    gt2 = gt2.astype(jnp.int32)

    if ignore_index is not None:
        valid = gt2 != ignore_index
        # reducing_list gather: identity unless ignore_index <= num_classes
        if ignore_index <= num_classes:
            gt_remap = jnp.where(gt2 > ignore_index, gt2 - 1, gt2)
        else:
            gt_remap = gt2
        gt2 = jnp.where(valid, gt_remap, -1)          # -1 = masked token

    # Token tile: big lane-dense tiles when L is large; single full-L tile otherwise.
    if L >= tile_l:
        tl = tile_l                                   # multiple of 128 by default
    else:
        tl = L                                        # block dim == full dim (always legal)
    grid_l = pl.cdiv(L, tl)
    l_pad = grid_l * tl

    # Only the tiny label array is padded; `pred` is streamed unpadded & in native dtype.
    gt_p = jnp.pad(gt2, ((0, 0), (0, l_pad - L)),
                   constant_values=-1).reshape(B, 1, l_pad)

    kernel = functools.partial(_smooth_ce_kernel,
                               label_smoothing=float(label_smoothing))

    dtype_bytes = jnp.dtype(pred3.dtype).itemsize
    cost = pl.CostEstimate(
        flops=6 * B * L * C,
        transcendentals=B * L * (C + 1),
        bytes_accessed=B * C * L * dtype_bytes + B * l_pad * 4
                       + B * grid_l * 8 * 128 * 4,
    )

    partials = pl.pallas_call(
        kernel,
        out_shape=jax.ShapeDtypeStruct((B, grid_l, 8, 128), jnp.float32),
        grid_spec=pltpu.PrefetchScalarGridSpec(
            num_scalar_prefetch=0,
            grid=(B, grid_l),
            in_specs=[
                pl.BlockSpec((1, C, tl), lambda b, l: (b, 0, l)),
                pl.BlockSpec((1, 1, tl), lambda b, l: (b, 0, l)),
            ],
            out_specs=pl.BlockSpec((1, 1, 8, 128), lambda b, l: (b, l, 0, 0)),
        ),
        compiler_params=pltpu.CompilerParams(
            dimension_semantics=("parallel", "parallel")),
        cost_estimate=cost,
    )(pred3, gt_p)

    loss_sum = jnp.sum(partials[:, :, 0, 0])
    count = jnp.sum(partials[:, :, 1, 0])
    # NaN when every label is ignored (count==0) — matches PyTorch mean-over-empty.
    return loss_sum / count


def _reference(pred, gt, *, label_smoothing, ignore_index, num_classes):
    """Pure-JAX reference reproducing the PyTorch forward (weight=None)."""
    p = jnp.moveaxis(pred, 1, -1).reshape(-1, pred.shape[1]).astype(jnp.float32)
    g = gt.reshape(-1)
    valid = (g != ignore_index).astype(jnp.float32)
    log_prob = jax.nn.log_softmax(p, axis=1)
    one_hot = jax.nn.one_hot(jnp.clip(g, 0, num_classes - 1), num_classes)
    eps = label_smoothing
    if eps > 0.0:
        target = one_hot * (1 - eps) + (1 - one_hot) * eps / (num_classes - 1)
    else:
        target = one_hot
    per_row = -jnp.sum(target * log_prob, axis=1)
    return jnp.sum(per_row * valid) / jnp.sum(valid)


if __name__ == "__main__":
    key = jax.random.PRNGKey(0)
    k1, k2, k3 = jax.random.split(key, 3)

    B, C, L = 2, 13, 16           # num_classes = 13 (module default)
    label_smoothing = 0.2
    ignore_index = 255

    pred = jax.random.normal(k1, (B, C, L), dtype=jnp.float32)
    gt = jax.random.randint(k2, (B, L), 0, C, dtype=jnp.int32)
    # sprinkle some ignored labels
    gt = jnp.where(jax.random.uniform(k3, (B, L)) < 0.2, ignore_index, gt)

    loss = smooth_cross_entropy(
        pred, gt,
        label_smoothing=label_smoothing,
        ignore_index=ignore_index,
        num_classes=C,
    )
    loss = jax.block_until_ready(loss)

    ref = _reference(pred, gt, label_smoothing=label_smoothing,
                     ignore_index=ignore_index, num_classes=C)
    assert jnp.allclose(loss, ref, rtol=1e-5, atol=1e-5), (loss, ref)

    print("KERNEL_OK")
</pallas_src>

<mosaic_0001>
module attributes {stable_mosaic.version = 11 : i64} {
  func.func @_smooth_ce_kernel(%arg0: i32, %arg1: i32, %arg2: memref<1x13x16xf32, #tpu.memory_space<vmem>>, %arg3: memref<1x1x16xi32, #tpu.memory_space<vmem>>, %arg4: memref<1x1x8x128xf32, #tpu.memory_space<vmem>>) attributes {dimension_semantics = [#tpu.dimension_semantics<parallel>, #tpu.dimension_semantics<parallel>], iteration_bounds = array<i64: 2, 1>, scalar_prefetch = 0 : i64, scratch_operands = 0 : i64, tpu.core_type = #tpu.core_type<tc>, window_params = [{transform_indices = @transform_0, window_bounds = array<i64: 1, 13, 16>}, {transform_indices = @transform_1, window_bounds = array<i64: 1, 1, 16>}, {transform_indices = @transform_2, window_bounds = array<i64: 1, 1, 8, 128>}]} {
    %c0 = arith.constant 0 : index
    %c0_0 = arith.constant 0 : index
    %c0_1 = arith.constant 0 : index
    %0 = vector.load %arg2[%c0, %c0_0, %c0_1] : memref<1x13x16xf32, #tpu.memory_space<vmem>>, vector<1x13x16xf32>
    %1 = vector.shape_cast %0 : vector<1x13x16xf32> to vector<13x16xf32>
    %c0_2 = arith.constant 0 : index
    %c0_3 = arith.constant 0 : index
    %c0_4 = arith.constant 0 : index
    %2 = vector.load %arg3[%c0_2, %c0_3, %c0_4] : memref<1x1x16xi32, #tpu.memory_space<vmem>>, vector<1x1x16xi32>
    %3 = vector.shape_cast %2 : vector<1x1x16xi32> to vector<1x16xi32>
    %cst = arith.constant dense<0xFF800000> : vector<16xf32>
    %4 = vector.multi_reduction <maximumf>, %1, %cst [0] : vector<13x16xf32> to vector<16xf32>
    %5 = vector.shape_cast %4 : vector<16xf32> to vector<1x16xf32>
    %6 = vector.broadcast %5 : vector<1x16xf32> to vector<13x16xf32>
    %7 = arith.subf %1, %6 : vector<13x16xf32>
    %8 = math.exp %7 : vector<13x16xf32>
    %cst_5 = arith.constant dense<0.000000e+00> : vector<16xf32>
    %9 = vector.multi_reduction <add>, %8, %cst_5 [0] : vector<13x16xf32> to vector<16xf32>
    %10 = vector.shape_cast %9 : vector<16xf32> to vector<1x16xf32>
    %11 = math.log %10 : vector<1x16xf32>
    %12 = tpu.iota {dimensions = array<i32: 0>} : vector<13x16xi32>
    %13 = vector.broadcast %3 : vector<1x16xi32> to vector<13x16xi32>
    %14 = arith.cmpi eq, %12, %13 : vector<13x16xi32>
    %cst_6 = arith.constant 0.000000e+00 : f32
    %15 = vector.broadcast %cst_6 : f32 to vector<13x16xf32>
    %16 = arith.select %14, %7, %15 : vector<13x16xi1>, vector<13x16xf32>
    %cst_7 = arith.constant dense<0.000000e+00> : vector<16xf32>
    %17 = vector.multi_reduction <add>, %16, %cst_7 [0] : vector<13x16xf32> to vector<16xf32>
    %18 = vector.shape_cast %17 : vector<16xf32> to vector<1x16xf32>
    %19 = arith.subf %18, %11 : vector<1x16xf32>
    %cst_8 = arith.constant dense<0.000000e+00> : vector<16xf32>
    %20 = vector.multi_reduction <add>, %7, %cst_8 [0] : vector<13x16xf32> to vector<16xf32>
    %21 = vector.shape_cast %20 : vector<16xf32> to vector<1x16xf32>
    %cst_9 = arith.constant 1.300000e+01 : f32
    %22 = vector.broadcast %cst_9 : f32 to vector<1x16xf32>
    %23 = arith.mulf %22, %11 : vector<1x16xf32>
    %24 = arith.subf %21, %23 : vector<1x16xf32>
    %cst_10 = arith.constant 0.783333361 : f32
    %25 = vector.broadcast %cst_10 : f32 to vector<1x16xf32>
    %26 = arith.mulf %25, %19 : vector<1x16xf32>
    %cst_11 = arith.constant 0.0166666675 : f32
    %27 = vector.broadcast %cst_11 : f32 to vector<1x16xf32>
    %28 = arith.mulf %27, %24 : vector<1x16xf32>
    %29 = arith.addf %26, %28 : vector<1x16xf32>
    %cst_12 = arith.constant 0.000000e+00 : f32
    %30 = vector.broadcast %cst_12 : f32 to vector<1x16xf32>
    %31 = arith.subf %30, %29 : vector<1x16xf32>
    %c0_i32 = arith.constant 0 : i32
    %32 = vector.broadcast %c0_i32 : i32 to vector<1x16xi32>
    %33 = arith.cmpi sge, %3, %32 : vector<1x16xi32>
    %cst_13 = arith.constant 0.000000e+00 : f32
    %34 = vector.broadcast %cst_13 : f32 to vector<1x16xf32>
    %35 = arith.select %33, %31, %34 : vector<1x16xi1>, vector<1x16xf32>
    %36 = vector.shape_cast %35 : vector<1x16xf32> to vector<1x1x16xf32>
    %cst_14 = arith.constant dense<0.000000e+00> : vector<1xf32>
    %37 = vector.multi_reduction <add>, %36, %cst_14 [1, 2] : vector<1x1x16xf32> to vector<1xf32>
    %38 = vector.shape_cast %37 : vector<1xf32> to vector<1x1x1xf32>
    %39 = vector.extract %38[0, 0, 0] : f32 from vector<1x1x1xf32>
    %40 = vector.broadcast %39 : f32 to vector<1x1xf32>
    %41 = arith.extui %33 : vector<1x16xi1> to vector<1x16xi32>
    %42 = arith.sitofp %41 : vector<1x16xi32> to vector<1x16xf32>
    %43 = vector.shape_cast %42 : vector<1x16xf32> to vector<1x1x16xf32>
    %cst_15 = arith.constant dense<0.000000e+00> : vector<1xf32>
    %44 = vector.multi_reduction <add>, %43, %cst_15 [1, 2] : vector<1x1x16xf32> to vector<1xf32>
    %45 = vector.shape_cast %44 : vector<1xf32> to vector<1x1x1xf32>
    %46 = vector.extract %45[0, 0, 0] : f32 from vector<1x1x1xf32>
    %47 = vector.broadcast %46 : f32 to vector<1x1xf32>
    %48 = tpu.iota {dimensions = array<i32: 0>} : vector<8x128xi32>
    %c0_i32_16 = arith.constant 0 : i32
    %49 = vector.broadcast %c0_i32_16 : i32 to vector<8x128xi32>
    %50 = arith.cmpi eq, %48, %49 : vector<8x128xi32>
    %c1_i32 = arith.constant 1 : i32
    %51 = vector.broadcast %c1_i32 : i32 to vector<8x128xi32>
    %52 = arith.cmpi eq, %48, %51 : vector<8x128xi32>
    %cst_17 = arith.constant 0.000000e+00 : f32
    %53 = vector.shape_cast %47 : vector<1x1xf32> to vector<1x1xf32>
    %54 = vector.broadcast %53 : vector<1x1xf32> to vector<8x128xf32>
    %55 = vector.broadcast %cst_17 : f32 to vector<8x128xf32>
    %56 = arith.select %52, %54, %55 : vector<8x128xi1>, vector<8x128xf32>
    %57 = vector.shape_cast %40 : vector<1x1xf32> to vector<1x1xf32>
    %58 = vector.broadcast %57 : vector<1x1xf32> to vector<8x128xf32>
    %59 = arith.select %50, %58, %56 : vector<8x128xi1>, vector<8x128xf32>
    %c0_18 = arith.constant 0 : index
    %c0_19 = arith.constant 0 : index
    %c0_20 = arith.constant 0 : index
    %c0_21 = arith.constant 0 : index
    %60 = vector.load %arg4[%c0_18, %c0_19, %c0_20, %c0_21] : memref<1x1x8x128xf32, #tpu.memory_space<vmem>>, vector<1x1x8x128xf32>
    %61 = vector.shape_cast %60 : vector<1x1x8x128xf32> to vector<8x128xf32>
    %62 = vector.shape_cast %59 : vector<8x128xf32> to vector<1x1x8x128xf32>
    tpu.vector_store %arg4[%c0_18, %c0_19, %c0_20, %c0_21], %62 {strides = array<i32>} : memref<1x1x8x128xf32, #tpu.memory_space<vmem>>, vector<1x1x8x128xf32>,
    return
  }
  func.func @transform_0(%arg0: i32, %arg1: i32) -> (i32, i32, i32) {
    %c0_i32 = arith.constant 0 : i32
    %c0_i32_0 = arith.constant 0 : i32
    return %arg0, %c0_i32, %arg1 : i32, i32, i32
  }
  func.func @transform_1(%arg0: i32, %arg1: i32) -> (i32, i32, i32) {
    %c0_i32 = arith.constant 0 : i32
    %c0_i32_0 = arith.constant 0 : i32
    return %arg0, %c0_i32, %arg1 : i32, i32, i32
  }
  func.func @transform_2(%arg0: i32, %arg1: i32) -> (i32, i32, i32, i32) {
    %c0_i32 = arith.constant 0 : i32
    %c0_i32_0 = arith.constant 0 : i32
    %c0_i32_1 = arith.constant 0 : i32
    return %arg0, %arg1, %c0_i32, %c0_i32_0 : i32, i32, i32, i32
  }
}

</mosaic_0001>

<bundles_post_ra>
// kernel: tpu_custom_call.1
= control target key start
LH: loop header
LB: loop body
LE: loop exit
PB: predicated region body
PF: predicated region fallthrough
CT: control target
= control target key end

     0   :  { %7 = vsyncpa [#allocation3], 0  ;;  %s690_s0 = inlined_call_operand.vmem [shape: f32[2,13,16], index: 0, kind: input, shape index: {}]   ;;  %s691_s1 = inlined_call_operand.vmem [shape: s32[2,1,16], index: 1, kind: input, shape index: {}]   ;;  %s692_s2 = inlined_call_operand.hbm [shape: f32[2,1,8,128], index: 2, kind: output, shape index: {}]  }
   0x1   :  { %9 = vsyncpa [#allocation3 + $0x1], 0  ;;  %s567_s9 = smov 0   ;;  %s569_s10 = smov 0  }
   0x2   :  { %s571_s11 = smov 0   ;;  %s573_s12 = smov 0  }
   0x3   :  { %s575_s13 = smov 0   ;;  %s577_s14 = smov 0  }
   0x4 LB: > { %s392_s15 = sadd.s32 4294967295, %s548_s14   ;;  %s393_s16 = sadd.s32 4294967294, %s548_s14   ;;  %s548_s14 = sphi %s577_s14, %s15_s14   ;;  %s544_s13 = sphi %s575_s13, %s699_s13   ;;  %s540_s12 = sphi %s573_s12, %s698_s12   ;;  %s536_s11 = sphi %s571_s11, %s697_s11   ;;  %s532_s10 = sphi %s569_s10, %s696_s10   ;;  %s528_s9 = sphi %s567_s9, %s695_s9  }
   0x5   : > { %s27_s17 = sadd.s32 1, %s544_s13  ;;  %s92_s18 = sadd.s32 1, %s536_s11 }
   0x6   : > { %p29_p0 = scmp.ge.s32.totalorder %s27_s17, 2  ;;  %p102_p1 = scmp.ne.s32.totalorder %s536_s11, %s532_s10 }
   0x7   : > { %p103_p2 = scmp.eq.s32.totalorder %s392_s15, 1  ;;  %p108_p3 = scmp.ne.s32.totalorder %s532_s10, %s528_s9 }
   0x8   : > { %s701_s17 = smov (%p29_p0, %s27_s17), 0  ;;  %p109_p5 = scmp.eq.s32.totalorder %s393_s16, 1 }
   0x9   : > { %p607_p4 = por %p103_p2, %p102_p1  ;;  %s87_s20 = ssub.s32 %s544_s13, %s701_s17 }
   0xa   : > { %p396_p6 = scmp.ge.s32.totalorder %s548_s14, 1  ;;  %p90_p7 = scmp.eq.s32.totalorder %s87_s20, 0 }
   0xb   : > { %p614_p8 = por %p109_p5, %p108_p3  ;;  %p147_p9 = scmp.lt.s32.totalorder %s548_s14, 3 }
   0xc   : > { %s620_s22 = scalar_select %p90_p7, %s536_s11, %s92_s18  }
   0xd   : > { %p148_p10 = pnand %p396_p6, %p147_p9 }
   0xe   : > { %p178_p11 = scmp.lt.s32.totalorder (!%p148_p10), %s540_s12, 1  ;;  %s175_s3 = sand.u32 (!%p148_p10), 1, %s532_s10  }
   0xf   : > { %151 = sbr.rel (%p148_p10) target bundleno = 322 (0x142), region = 28  ;;  %s397_s4 = sshll.u32 (!%p148_p10), %s175_s3, 3 }
  0x10   : > { %s402_s5 = sshll.u32 (!%p148_p10), %s540_s12, 7  ;;  %s177_s7 = scalar_lea.vmem (!%p148_p10), [#allocation2], %s397_s4 }
  0x11   : > { %s306_s8 = sshll.u32 (!%p148_p10), %s177_s7, 4  ;;  %s650_s20 = scalar_lea.hbm (!%p148_p10), %s692_s2, %s402_s5  ;;  %s307_s8 = int_to_ptr.vmem [resolvable:$true] %s306_s8 }
  0x14   : > { %s179_s23 = scalar_select %p178_p11, %s540_s12, 1  ;;  %vm195_vm0 = vcmask 130048   ;;  %vm197_vm1 = vcmask 126976   ;;  %v223_v10 = vlaneseq  ;;  %vm261_vm5 = vcmask 122880  }
  0x15   : > { %v550_v62 = vmov 0.0   ;;  %s292_s12 = scalar_lea.sflag [#allocation3], %s175_s3 }
  0x16   : > { %s405_s24 = sshll.u32 %s179_s23, 4  ;;  %v629_v14 = vshrl.u32 %v223_v10, 7  ;;  %s191_s30 = scalar_lea.vmem %s691_s1, %s179_s23 }
  0x17   : > { %s185_s27 = scalar_lea.vmem %s690_s0, %s405_s24  ;;  %v194_v18 = vld [vmem:[%s191_s30] sm:$0x1]  ;;  %s472_s23 = scalar_lea.vmem %s307_s8, 128 }
  0x18   : > { %v192_v0 = vld [vmem:[%s185_s27] sm:$0xff]  ;;  %v193_v1 = vld [vmem:[%s185_s27 + $0x8] sm:$0x1f]  ;;  %v228_v17 = vsub.s32 0, %v629_v14  ;;  %v225_v19 = vadd.s32 8, %v629_v14  ;;  %vm259_vm4 = vcmp.ge.s32.totalorder %v194_v18, 0  ;;  %p473_p12 = scmp.ne.s32.totalorder %s307_s8, %s472_s23 }
  0x19   : > { %v196_v2 = vsel %vm195_vm0, %v192_v0, -inf  ;;  %v198_v3 = vsel %vm197_vm1, %v193_v1, -inf  ;;  %v400_v63 = vsel %vm259_vm4, 1.0, %v550_v62  ;;  %vm285_vm6 = vcmp.eq.s32.totalorder %v629_v14, 1  ;;  %s551_s24 = smov [#allocation2]  }
  0x1a   : > { %v199_v4 = vmax.f32 %v196_v2, %v198_v3  ;;  %v229_v20 = vrot.slane %v194_v18, %v228_v17  ;;  %vm284_vm7 = vcmp.eq.s32.totalorder %v629_v14, 0  ;;  %p474_p13 = pnand %p473_p12, %p607_p4  ;;  %s476_s25 = sshll.u32 %s551_s24, 4  ;;  %s477_s25 = int_to_ptr.vmem [resolvable:$false] %s476_s25 }
  0x1b   : > { %s478_s26 = scalar_lea.vmem %s477_s25, 256  ;;  %p479_p1 = scmp.lt.s32.totalorder %s307_s8, %s477_s25 }
  0x1c   : > { %v200_v5 = vrot.slane %v199_v4, 4  ;;  %vm230_vm2 = vcmp.eq.s32.totalorder %v629_v14, %v229_v20  ;;  %vm231_vm3 = vcmp.eq.s32.totalorder %v225_v19, %v229_v20  ;;  %p475_p0 = pneg %p474_p13  ;;  %p480_p2 = scmp.lt.s32.totalorder %s478_s26, %s472_s23 }
  0x1e   : > { %v201_v6 = vmax.f32 %v199_v4, %v200_v5  ;;  %p481_p3 = por %p480_p2, %p479_p1 }
  0x20   : > { %v202_v7 = vrot.slane %v201_v6, 2  ;;  %p482_p5 = pnand %p481_p3, %p475_p0 }
  0x22   : > { %v203_v8 = vmax.f32 %v201_v6, %v202_v7 }
  0x24   : > { %v204_v9 = vrot.slane %v203_v8, 1 }
  0x26   : > { %v205_v11 = vmax.f32 %v203_v8, %v204_v9 }
  0x28   : > { %v206_v12 = vsub.f32 %v192_v0, %v205_v11  ;;  %v207_v13 = vsub.f32 %v193_v1, %v205_v11  ;;  %v274_v1 = vsel %vm261_vm5, %v400_v63, 0.0 }
  0x2a   : > { %v208_v15 = vmul.f32 1.442695, %v206_v12  ;;  %v210_v16 = vmul.f32 1.442695, %v207_v13  ;;  %v232_v21 = vsel %vm230_vm2, %v206_v12, 0.0  ;;  %v233_v22 = vsel %vm231_vm3, %v207_v13, 0.0 }
  0x2b   : > { %v234_v27 = vsel %vm195_vm0, %v232_v21, 0.0  ;;  %v235_v28 = vsel %vm197_vm1, %v233_v22, 0.0  ;;  %v244_v30 = vsel %vm195_vm0, %v206_v12, 0.0  ;;  %v245_v31 = vsel %vm197_vm1, %v207_v13, 0.0 }
  0x2c   : > { %466 = vpow2.f32 %v208_v15  ;;  %v236_v33 = vadd.f32 %v235_v28, %v234_v27  ;;  %v246_v35 = vadd.f32 %v245_v31, %v244_v30 }
  0x2d   : > { %468 = vpow2.f32 %v210_v16 }
  0x2e   : > { %v237_v37 = vrot.slane %v236_v33, 4  ;;  %v247_v39 = vrot.slane %v246_v35, 4 }
  0x30   : > { %v238_v41 = vadd.f32 %v237_v37, %v236_v33  ;;  %v248_v43 = vadd.f32 %v247_v39, %v246_v35 }
  0x32   : > { %v239_v44 = vrot.slane %v238_v41, 2  ;;  %v249_v45 = vrot.slane %v248_v43, 2 }
  0x34   : > { %v240_v46 = vadd.f32 %v239_v44, %v238_v41  ;;  %v250_v47 = vadd.f32 %v249_v45, %v248_v43 }
  0x36   : > { %v241_v48 = vrot.slane %v240_v46, 1  ;;  %v251_v49 = vrot.slane %v250_v47, 1 }
  0x38   : > { %v242_v50 = vadd.f32 %v241_v48, %v240_v46  ;;  %v252_v53 = vadd.f32 %v251_v49, %v250_v47 }
  0x39   : > { %v467_v23 = vpop.eup %466 }
  0x3a   : > { %v469_v24 = vpop.eup %468  ;;  %v212_v25 = vsel %vm195_vm0, %v467_v23, 0.0 }
  0x3b   : > { %v213_v26 = vsel %vm197_vm1, %v469_v24, 0.0 }
  0x3c   : > { %v214_v29 = vadd.f32 %v213_v26, %v212_v25 }
  0x3e   : > { %v215_v32 = vrot.slane %v214_v29, 4 }
  0x40   : > { %v216_v34 = vadd.f32 %v215_v32, %v214_v29 }
  0x42   : > { %v217_v36 = vrot.slane %v216_v34, 2 }
  0x44   : > { %v218_v38 = vadd.f32 %v217_v36, %v216_v34 }
  0x46   : > { %v219_v40 = vrot.slane %v218_v38, 1 }
  0x48   : > { %v220_v42 = vadd.f32 %v219_v40, %v218_v38 }
  0x4a   : > { %470 = vlog2.f32 %v220_v42 }
  0x57   : > { %v471_v51 = vpop.eup %470 }
  0x58   : > { %v222_v52 = vmul.f32 0.6931472, %v471_v51 }
  0x5a   : > { %v243_v54 = vsub.f32 %v242_v50, %v222_v52  ;;  %v253_v55 = vmul.f32 13.0, %v222_v52 }
  0x5c   : > { %v254_v56 = vsub.f32 %v252_v53, %v253_v55  ;;  %v255_v57 = vmul.f32 0.78333336, %v243_v54 }
  0x5e   : > { %v256_v58 = vmul.f32 0.016666668, %v254_v56 }
  0x60   : > { %v257_v59 = vadd.f32 %v256_v58, %v255_v57 }
  0x62   : > { %v258_v60 = vsub.f32 0.0, %v257_v59 }
  0x64   : > { %v260_v61 = vsel %vm259_vm4, %v258_v60, 0.0 }
  0x65   : > { %v262_v0 = vsel %vm261_vm5, %v260_v61, 0.0 }
  0x66   : > { %263 = vadd.xlane.f32.xlu0 %v262_v0 }
  0x6a   : > { %275 = vadd.xlane.f32.xlu0 %v274_v1 }
  0xef   : > { %v264_v2 = vpop.xlane.xlu0 %263 }
  0xf0   : > { %v265_v3 = vrot.slane %v264_v2, 4 }
  0xf2   : > { %v266_v4 = vadd.f32 %v265_v3, %v264_v2 }
  0xf3   : > { %v276_v5 = vpop.xlane.xlu0 %275 }
  0xf4   : > { %v267_v6 = vrot.slane %v266_v4, 2  ;;  %v277_v7 = vrot.slane %v276_v5, 4 }
  0xf6   : > { %v278_v8 = vadd.f32 %v277_v7, %v276_v5  ;;  %v268_v9 = vadd.f32 %v267_v6, %v266_v4 }
  0xf8   : > { %v279_v10 = vrot.slane %v278_v8, 2  ;;  %v269_v11 = vrot.slane %v268_v9, 1 }
  0xfa   : > { %v280_v12 = vadd.f32 %v279_v10, %v278_v8  ;;  %v270_v13 = vadd.f32 %v269_v11, %v268_v9 }
  0xfc   : > { %406 = vpush %v270_v13  ;;  %v281_v15 = vrot.slane %v280_v12, 1 }
  0xfe   : > { %v282_v16 = vadd.f32 %v281_v15, %v280_v12 }
 0x100   : > { %408 = vpush %v282_v16 }
 0x12d   : > { %s407_s6 = spop %406 }
 0x12e   : > { %v288_v18 = vstv %s407_s6 }
 0x131   : > { %s409_s15 = spop %408 }
 0x132   : > { %v286_v17 = vstv %s409_s15 }
 0x133   : > { %v287_v19 = vsel %vm285_vm6, %v286_v17, 0.0 }
 0x134   : > { %v289_v20 = vsel %vm284_vm7, %v288_v18, %v287_v19 }
 0x135   : > { %290 = vst [vmem:[%s177_s7] sm:$0xff] %v289_v20 }
 0x136   : > { %485 = shalt.err (!%p482_p5)
}
 0x137   : > { %s486_s27 = scalar_lea.hbm %s650_s20, 128  ;;  %s490_s30 = scalar_lea.hbm %s692_s2, 256 }
 0x138   : > { %p487_p6 = scmp.ne.s32.totalorder %s650_s20, %s486_s27  ;;  %p491_p10 = scmp.lt.s32.totalorder %s650_s20, %s692_s2 }
 0x139   : > { %p492_p11 = scmp.lt.s32.totalorder %s490_s30, %s486_s27 }
 0x13a   : > { %p488_p7 = pnand %p487_p6, %p607_p4 }
 0x13b   : > { %p493_p12 = por %p492_p11, %p491_p10 }
 0x13c   : > { %p489_p9 = pneg %p488_p7 }
 0x13e   : > { %p494_p13 = pnand %p493_p12, %p489_p9 }
 0x140   : > { %497 = shalt.err (!%p494_p13)
}
 0x141   : > { %410 = dma.vmem_to_hbm [thread:$0]  (%p607_p4), %s307_s8, 128, %s650_s20, %s292_s12  }
 0x142 PF: > { %p416_p0 = scmp.ge.s32.totalorder %s548_s14, 2  ;;  %s318_s5 = sand.u32 1, %s528_s9  }
 0x143   : > { %s319_s6 = scalar_lea.sflag [#allocation3], %s318_s5 }
 0x144   : > { %p413_p1 = pnand %p416_p0, %p614_p8 }
 0x146   : > { %p414_p2 = pneg %p413_p1 }
 0x148   : > { %523 = dma.done.wait (%p414_p2), %s319_s6, 128  }
 0x149   : > { %525 = vsyncadd (%p414_p2), %s319_s6, 4294967168  ;;  %s15_s14 = sadd.s32 1, %s548_s14   ;;  %s695_s9 = smov %s532_s10 }
 0x14a   : > { %p12_p3 = scmp.ge.s32.totalorder %s15_s14, 4   ;;  %s696_s10 = smov %s536_s11 }
 0x14b   : > { %s697_s11 = smov %s620_s22  ;;  %s698_s12 = smov %s544_s13 }
 0x14c   : > { %s699_s13 = smov %s701_s17  ;;  %14 = sbr.rel (!%p12_p3) target bundleno = 4 (0x4), region = 66 }
 0x151   :  { %324 = vsyncpa [#allocation3], 1 }
 0x152   :  { %326 = vsyncpa [#allocation3 + $0x1], 1 }

</bundles_post_ra>
